<compile_context>
chip_gen: v5e
topology: v5e:2x2
jax: 0.10.0
libtpu: 0.0.40
codegen_flags: <defaults>
</compile_context>

<pallas_src>
import functools

import jax
import jax.numpy as jnp
from jax.experimental import pallas as pl
from jax.experimental.pallas import tpu as pltpu


def _policy_net_kernel(x_ref, w1_ref, w23_ref, b_ref, o_ref, *, hidden_dim):
    H = hidden_dim
    # x arrives f32; cast to bf16 in-kernel (no standalone XLA cast op).
    x = x_ref[...].astype(jnp.bfloat16)                               # (tb, S)
    h1 = jnp.dot(x, w1_ref[...], preferred_element_type=jnp.float32)
    h1 = jnp.maximum(h1 + b_ref[:, 0:H], 0.0)                         # (tb, H)
    # Dropout(0.1) -> identity in eval mode.
    h2 = jnp.dot(h1.astype(jnp.bfloat16), w23_ref[:, 0:H],
                 preferred_element_type=jnp.float32)
    h2 = jnp.maximum(h2 + b_ref[:, H:2 * H], 0.0)                     # (tb, H)
    # Dropout(0.1) -> identity in eval mode.
    out = jnp.dot(h2.astype(jnp.bfloat16), w23_ref[:, H:],
                  preferred_element_type=jnp.float32)
    o_ref[...] = (out + b_ref[:, 2 * H:]).astype(o_ref.dtype)         # (tb, Ap)


def prepare_params(params):
    """One-time weight prep: bf16 cast, A->A_pad padding, buffer fusion.

    Call once per parameter set (NOT per forward call).
    """
    w1, b1, w2, b2, w3, b3 = (params["w1"], params["b1"], params["w2"],
                              params["b2"], params["w3"], params["b3"])
    S, H = w1.shape
    A = w3.shape[1]
    A_pad = ((A + 127) // 128) * 128
    if A_pad != A:
        w3 = jnp.pad(w3, ((0, 0), (0, A_pad - A)))
        b3 = jnp.pad(b3, ((0, 0), (0, A_pad - A)))
    return dict(
        w1=w1.astype(jnp.bfloat16),                                   # (S, H)
        w23=jnp.concatenate([w2, w3], axis=1).astype(jnp.bfloat16),   # (H, H+Ap)
        b_all=jnp.concatenate([b1, b2, b3], axis=1).astype(jnp.float32),
        state_dim=S, hidden_dim=H, action_dim=A, A_pad=A_pad,
    )


def policy_net_forward(x, prep, *, tile_b=None):
    """x: (B, state_dim) float32.  prep: output of prepare_params()."""
    B, S = x.shape
    H, A, A_pad = prep["hidden_dim"], prep["action_dim"], prep["A_pad"]
    assert S == prep["state_dim"]

    # Round tile_b up to a multiple of 16 (bf16 sublane packing of the x tile,
    # 8-sublane-aligned f32 output store) and cap at 256.
    if tile_b is None:
        tile_b = min(256, ((B + 15) // 16) * 16)
    B_pad = pl.cdiv(B, tile_b) * tile_b
    if B_pad != B:
        x = jnp.pad(x, ((0, B_pad - B), (0, 0)))

    grid = (B_pad // tile_b,)

    flops = 2 * B_pad * (S * H + H * H + H * A_pad)
    bytes_accessed = (x.size * 4 + prep["w1"].size * 2 + prep["w23"].size * 2
                      + prep["b_all"].size * 4 + B_pad * A_pad * 4)
    cost = pl.CostEstimate(flops=flops, transcendentals=0,
                           bytes_accessed=bytes_accessed)

    kernel = functools.partial(_policy_net_kernel, hidden_dim=H)

    out_padded = pl.pallas_call(
        kernel,
        out_shape=jax.ShapeDtypeStruct((B_pad, A_pad), jnp.float32),
        grid_spec=pltpu.PrefetchScalarGridSpec(
            num_scalar_prefetch=0,
            grid=grid,
            in_specs=[
                pl.BlockSpec((tile_b, S), lambda i: (i, 0)),          # x (f32)
                pl.BlockSpec((S, H), lambda i: (0, 0)),               # w1 (bf16)
                pl.BlockSpec((H, H + A_pad), lambda i: (0, 0)),       # w2||w3 (bf16)
                pl.BlockSpec((1, 2 * H + A_pad), lambda i: (0, 0)),   # b1||b2||b3 (f32)
            ],
            out_specs=pl.BlockSpec((tile_b, A_pad), lambda i: (i, 0)),
        ),
        compiler_params=pltpu.CompilerParams(
            dimension_semantics=("parallel",)),
        cost_estimate=cost,
    )(x, prep["w1"], prep["w23"], prep["b_all"])

    return out_padded[:B, :A]


def init_params(key, state_dim, action_dim, hidden_dim=128):
    """Deterministic init (uniform, PyTorch-Linear-like fan-in scaling)."""
    ks = jax.random.split(key, 6)

    def lin(kw, kb, fan_in, fan_out):
        bound = 1.0 / jnp.sqrt(fan_in)
        w = jax.random.uniform(kw, (fan_in, fan_out), jnp.float32,
                               minval=-bound, maxval=bound)
        b = jax.random.uniform(kb, (1, fan_out), jnp.float32,
                               minval=-bound, maxval=bound)
        return w, b

    w1, b1 = lin(ks[0], ks[1], state_dim, hidden_dim)
    w2, b2 = lin(ks[2], ks[3], hidden_dim, hidden_dim)
    w3, b3 = lin(ks[4], ks[5], hidden_dim, action_dim)
    return dict(w1=w1, b1=b1, w2=w2, b2=b2, w3=w3, b3=b3)


def reference_forward_bf16(x, p):
    """Same math as the kernel (bf16 operands, f32 accumulation), plain JAX."""
    xb = x.astype(jnp.bfloat16)
    w1 = p["w1"].astype(jnp.bfloat16)
    w2 = p["w2"].astype(jnp.bfloat16)
    w3 = p["w3"].astype(jnp.bfloat16)
    h1 = jnp.maximum(
        jnp.dot(xb, w1, preferred_element_type=jnp.float32) + p["b1"], 0.0)
    h2 = jnp.maximum(
        jnp.dot(h1.astype(jnp.bfloat16), w2,
                preferred_element_type=jnp.float32) + p["b2"], 0.0)
    return jnp.dot(h2.astype(jnp.bfloat16), w3,
                   preferred_element_type=jnp.float32) + p["b3"]


def reference_forward_f32(x, p):
    h1 = jnp.maximum(x @ p["w1"] + p["b1"], 0.0)
    h2 = jnp.maximum(h1 @ p["w2"] + p["b2"], 0.0)
    return h2 @ p["w3"] + p["b3"]


if __name__ == "__main__":
    key = jax.random.PRNGKey(0)
    k_x, k_p = jax.random.split(key)

    batch, state_dim, hidden_dim, action_dim = 32, 16, 128, 8
    x = jax.random.normal(k_x, (batch, state_dim), jnp.float32)
    params = init_params(k_p, state_dim, action_dim, hidden_dim)

    # One-time prep (bf16 weights, padded/fused buffers) — not per call.
    prep = prepare_params(params)

    out = policy_net_forward(x, prep)
    out = jax.block_until_ready(out)
    assert out.shape == (batch, action_dim)

    # Exact-path check (bf16 operands, f32 accumulation on both sides).
    ref_bf16 = reference_forward_bf16(x, params)
    assert jnp.allclose(out, ref_bf16, atol=1e-3, rtol=1e-3), \
        "mismatch vs bf16 reference"

    # Sanity check against full-f32 PyTorch-equivalent math (loose tolerance
    # for the bf16 operand cast).
    ref_f32 = reference_forward_f32(x, params)
    assert jnp.allclose(out, ref_f32, atol=5e-2, rtol=5e-2), \
        "mismatch vs f32 reference"

    print("KERNEL_OK")
</pallas_src>

<mosaic_0001>
module attributes {stable_mosaic.version = 11 : i64} {
  func.func @_policy_net_kernel(%arg0: i32, %arg1: memref<32x16xf32, #tpu.memory_space<vmem>>, %arg2: memref<16x128xbf16, #tpu.memory_space<vmem>>, %arg3: memref<128x256xbf16, #tpu.memory_space<vmem>>, %arg4: memref<1x384xf32, #tpu.memory_space<vmem>>, %arg5: memref<32x128xf32, #tpu.memory_space<vmem>>) attributes {dimension_semantics = [#tpu.dimension_semantics<parallel>], iteration_bounds = array<i64: 1>, scalar_prefetch = 0 : i64, scratch_operands = 0 : i64, tpu.core_type = #tpu.core_type<tc>, window_params = [{transform_indices = @transform_0, window_bounds = array<i64: 32, 16>}, {pipeline_mode = #tpu.pipeline_mode<synchronous>, transform_indices = @transform_1, window_bounds = array<i64: 16, 128>}, {pipeline_mode = #tpu.pipeline_mode<synchronous>, transform_indices = @transform_2, window_bounds = array<i64: 128, 256>}, {pipeline_mode = #tpu.pipeline_mode<synchronous>, transform_indices = @transform_3, window_bounds = array<i64: 1, 384>}, {transform_indices = @transform_4, window_bounds = array<i64: 32, 128>}]} {
    %c0 = arith.constant 0 : index
    %c0_0 = arith.constant 0 : index
    %0 = vector.load %arg1[%c0, %c0_0] : memref<32x16xf32, #tpu.memory_space<vmem>>, vector<32x16xf32>
    %1 = arith.truncf %0 : vector<32x16xf32> to vector<32x16xbf16>
    %c0_1 = arith.constant 0 : index
    %c0_2 = arith.constant 0 : index
    %2 = vector.load %arg2[%c0_1, %c0_2] : memref<16x128xbf16, #tpu.memory_space<vmem>>, vector<16x128xbf16>
    %cst = arith.constant dense<0.000000e+00> : vector<32x128xf32>
    %3 = tpu.matmul %1, %2, %cst {dimension_numbers = #tpu.dot_dimension_numbers<[1], [0], [0], [1], [0, 0, 1, 1], [], []>} : vector<32x16xbf16>, vector<16x128xbf16>, vector<32x128xf32> -> vector<32x128xf32>
    %c0_3 = arith.constant 0 : index
    %c0_4 = arith.constant 0 : index
    %4 = vector.load %arg4[%c0_3, %c0_4] : memref<1x384xf32, #tpu.memory_space<vmem>>, vector<1x128xf32>
    %5 = vector.broadcast %4 : vector<1x128xf32> to vector<32x128xf32>
    %6 = arith.addf %3, %5 : vector<32x128xf32>
    %cst_5 = arith.constant 0.000000e+00 : f32
    %7 = vector.broadcast %cst_5 : f32 to vector<32x128xf32>
    %8 = arith.maximumf %6, %7 : vector<32x128xf32>
    %9 = arith.truncf %8 : vector<32x128xf32> to vector<32x128xbf16>
    %c0_6 = arith.constant 0 : index
    %c0_7 = arith.constant 0 : index
    %10 = vector.load %arg3[%c0_6, %c0_7] : memref<128x256xbf16, #tpu.memory_space<vmem>>, vector<128x128xbf16>
    %cst_8 = arith.constant dense<0.000000e+00> : vector<32x128xf32>
    %11 = tpu.matmul %9, %10, %cst_8 {dimension_numbers = #tpu.dot_dimension_numbers<[1], [0], [0], [1], [0, 0, 1, 1], [], []>} : vector<32x128xbf16>, vector<128x128xbf16>, vector<32x128xf32> -> vector<32x128xf32>
    %c0_9 = arith.constant 0 : index
    %c128 = arith.constant 128 : index
    %12 = vector.load %arg4[%c0_9, %c128] : memref<1x384xf32, #tpu.memory_space<vmem>>, vector<1x128xf32>
    %13 = vector.broadcast %12 : vector<1x128xf32> to vector<32x128xf32>
    %14 = arith.addf %11, %13 : vector<32x128xf32>
    %cst_10 = arith.constant 0.000000e+00 : f32
    %15 = vector.broadcast %cst_10 : f32 to vector<32x128xf32>
    %16 = arith.maximumf %14, %15 : vector<32x128xf32>
    %17 = arith.truncf %16 : vector<32x128xf32> to vector<32x128xbf16>
    %c0_11 = arith.constant 0 : index
    %c128_12 = arith.constant 128 : index
    %18 = vector.load %arg3[%c0_11, %c128_12] : memref<128x256xbf16, #tpu.memory_space<vmem>>, vector<128x128xbf16>
    %cst_13 = arith.constant dense<0.000000e+00> : vector<32x128xf32>
    %19 = tpu.matmul %17, %18, %cst_13 {dimension_numbers = #tpu.dot_dimension_numbers<[1], [0], [0], [1], [0, 0, 1, 1], [], []>} : vector<32x128xbf16>, vector<128x128xbf16>, vector<32x128xf32> -> vector<32x128xf32>
    %c0_14 = arith.constant 0 : index
    %c256 = arith.constant 256 : index
    %20 = vector.load %arg4[%c0_14, %c256] : memref<1x384xf32, #tpu.memory_space<vmem>>, vector<1x128xf32>
    %21 = vector.broadcast %20 : vector<1x128xf32> to vector<32x128xf32>
    %22 = arith.addf %19, %21 : vector<32x128xf32>
    %c0_15 = arith.constant 0 : index
    %c0_16 = arith.constant 0 : index
    %23 = vector.load %arg5[%c0_15, %c0_16] : memref<32x128xf32, #tpu.memory_space<vmem>>, vector<32x128xf32>
    tpu.vector_store %arg5[%c0_15, %c0_16], %22 {strides = array<i32>} : memref<32x128xf32, #tpu.memory_space<vmem>>, vector<32x128xf32>,
    return
  }
  func.func @transform_0(%arg0: i32) -> (i32, i32) {
    %c0_i32 = arith.constant 0 : i32
    %c0_i32_0 = arith.constant 0 : i32
    return %arg0, %c0_i32 : i32, i32
  }
  func.func @transform_1(%arg0: i32) -> (i32, i32) {
    %c0_i32 = arith.constant 0 : i32
    %c0_i32_0 = arith.constant 0 : i32
    %c0_i32_1 = arith.constant 0 : i32
    return %c0_i32, %c0_i32_0 : i32, i32
  }
  func.func @transform_2(%arg0: i32) -> (i32, i32) {
    %c0_i32 = arith.constant 0 : i32
    %c0_i32_0 = arith.constant 0 : i32
    %c0_i32_1 = arith.constant 0 : i32
    return %c0_i32, %c0_i32_0 : i32, i32
  }
  func.func @transform_3(%arg0: i32) -> (i32, i32) {
    %c0_i32 = arith.constant 0 : i32
    %c0_i32_0 = arith.constant 0 : i32
    %c0_i32_1 = arith.constant 0 : i32
    return %c0_i32, %c0_i32_0 : i32, i32
  }
  func.func @transform_4(%arg0: i32) -> (i32, i32) {
    %c0_i32 = arith.constant 0 : i32
    %c0_i32_0 = arith.constant 0 : i32
    return %arg0, %c0_i32 : i32, i32
  }
}

</mosaic_0001>

<bundles_post_ra>
// kernel: tpu_custom_call.1
= control target key start
LH: loop header
LB: loop body
LE: loop exit
PB: predicated region body
PF: predicated region fallthrough
CT: control target
= control target key end

     0   :  { %9 = vsyncpa [#allocation3], 0  ;;  %s517_s0 = inlined_call_operand.vmem [shape: f32[32,16], index: 0, kind: input, shape index: {}]   ;;  %s518_s1 = inlined_call_operand.vmem [shape: bf16[16,128], index: 1, kind: input, shape index: {}]   ;;  %s519_s2 = inlined_call_operand.hbm [shape: bf16[128,256], index: 2, kind: input, shape index: {}]   ;;  %s520_s3 = inlined_call_operand.vmem [shape: f32[1,384], index: 3, kind: input, shape index: {}]   ;;  %s521_s4 = inlined_call_operand.hbm [shape: f32[32,128], index: 4, kind: output, shape index: {}]  }
   0x1   :  { %10 = vsyncpa [#allocation4], 0  ;;  %s19_s17 = sshll.u32 %s519_s2, 4  ;;  %s450_s18 = smov [#allocation2]   ;;  %s20_s17 = int_to_ptr.hbm [resolvable:$true] %s19_s17 }
   0x2   :  { %s21_s19 = sshll.u32 %s450_s18, 4  ;;  %s451_s20 = smov 128   ;;  %s22_s19 = int_to_ptr.vmem [resolvable:$true] %s21_s19 }
   0x3   :  { %s452_s21 = smov 8  }
   0x4   :  { %27 = dma.hbm_to_vmem [thread:$0]  %s20_s17, 2048, %s22_s19, [#allocation3], %s451_s20, %s451_s20, %s452_s21  }
   0x5   :  { %446 = dma.done.wait [#allocation3], 2048  }
   0x6   :  { %447 = vsyncadd [#allocation3], 4294965248  ;;  %v358_v0 = vld [vmem:[%s518_s1] sm:$0xff]  ;;  %v36_v2 = vld [vmem:[%s517_s0 + $0x8] sm:$0xff]  ;;  %vm53_vm0 = vcmask 130048   ;;  %s453_s9 = smov [#allocation5]  }
   0x7   :  { %v35_v1 = vld [vmem:[%s517_s0] sm:$0xff]  ;;  %v324_v4 = vld [vmem:[#allocation2 + $0x70] sm:$0xf]  ;;  %67 = vmatpush.bf16.msra.mxu0 %v358_v0  ;;  %v366_v5 = vld [vmem:[#allocation2 + $0x74] sm:$0xf0]  ;;  %s273_s10 = sshll.u32 %s453_s9, 4  ;;  %s274_s10 = int_to_ptr.vmem [resolvable:$true] %s273_s10 }
   0x8   :  { %v39_v3 = vpack.c.bf16 %v36_v2, %v35_v1  ;;  %v320_v6 = vld [vmem:[#allocation2 + $0x60] sm:$0xf]  ;;  %v365_v7 = vld [vmem:[#allocation2 + $0x64] sm:$0xf0]  ;;  %v325_v8 = vor.u32 %v366_v5, %v324_v4  ;;  %v316_v10 = vld [vmem:[#allocation2 + $0x50] sm:$0xf] }
   0x9   :  { %v321_v9 = vor.u32 %v365_v7, %v320_v6  ;;  %v364_v11 = vld [vmem:[#allocation2 + $0x54] sm:$0xf0]  ;;  %v312_v13 = vld [vmem:[#allocation2 + $0x40] sm:$0xf]  ;;  %v363_v14 = vld [vmem:[#allocation2 + $0x44] sm:$0xf0] }
   0xa   :  { %292 = vmatmul.msk.bf16.vlgmr.msra.gmra.mxu0 %vm53_vm0, %v39_v3  ;;  %153 = vmatpush.bf16.msra.mxu1 %v325_v8  ;;  %v317_v12 = vor.u32 %v364_v11, %v316_v10  ;;  %v313_v15 = vor.u32 %v363_v14, %v312_v13  ;;  %v37_v16 = vld [vmem:[%s517_s0 + $0x10] sm:$0xff]  ;;  %v38_v17 = vld [vmem:[%s517_s0 + $0x18] sm:$0xff]  ;;  %v304_v22 = vld [vmem:[#allocation2 + $0x20] sm:$0xf]  ;;  %s275_s13 = sshll.u32 %s521_s4, 4  ;;  %s276_s13 = int_to_ptr.hbm [resolvable:$true] %s275_s13 }
   0xb   :  { %375 = vmatpush.bf16.msra.mxu3 %v325_v8  ;;  %v40_v18 = vpack.c.bf16 %v38_v17, %v37_v16  ;;  %v308_v19 = vld [vmem:[#allocation2 + $0x30] sm:$0xf]  ;;  %v362_v20 = vld [vmem:[#allocation2 + $0x34] sm:$0xf0]  ;;  %v361_v23 = vld [vmem:[#allocation2 + $0x24] sm:$0xf0] }
   0xc   :  { %v309_v21 = vor.u32 %v362_v20, %v308_v19  ;;  %v305_v24 = vor.u32 %v361_v23, %v304_v22  ;;  %v300_v25 = vld [vmem:[#allocation2 + $0x10] sm:$0xf]  ;;  %v360_v26 = vld [vmem:[#allocation2 + $0x14] sm:$0xf0]  ;;  %v296_v28 = vld [vmem:[#allocation2] sm:$0xf] }
   0xd   :  { %v301_v27 = vor.u32 %v360_v26, %v300_v25  ;;  %v359_v29 = vld [vmem:[#allocation2 + $0x4] sm:$0xf0]  ;;  %v356_v31 = vld [vmem:[#allocation2 + $0x74] sm:$0xf]  ;;  %v374_v32 = vld [vmem:[#allocation2 + $0x78] sm:$0xf0] }
   0xe   :  { %154 = vmatpush.bf16.msra.mxu1 %v321_v9  ;;  %v297_v30 = vor.u32 %v359_v29, %v296_v28  ;;  %v352_v33 = vld [vmem:[#allocation2 + $0x64] sm:$0xf]  ;;  %v357_v35 = vor.u32 %v374_v32, %v356_v31  ;;  %v373_v36 = vld [vmem:[#allocation2 + $0x68] sm:$0xf0]  ;;  %v395_v38 = vld [vmem:[%s520_s3] ss:$0 sm:$0xff] }
   0xf   :  { %376 = vmatpush.bf16.msra.mxu3 %v321_v9  ;;  %v353_v37 = vor.u32 %v373_v36, %v352_v33  ;;  %v348_v39 = vld [vmem:[#allocation2 + $0x54] sm:$0xf]  ;;  %v372_v40 = vld [vmem:[#allocation2 + $0x58] sm:$0xf0]  ;;  %v344_v43 = vld [vmem:[#allocation2 + $0x44] sm:$0xf] }
  0x10   :  { %246 = vmatpush.bf16.msrb.mxu0 %v357_v35  ;;  %383 = vmatpush.bf16.msra.mxu2 %v357_v35  ;;  %v349_v41 = vor.u32 %v372_v40, %v348_v39  ;;  %v371_v44 = vld [vmem:[#allocation2 + $0x48] sm:$0xf0]  ;;  %v340_v58 = vld [vmem:[#allocation2 + $0x34] sm:$0xf]  ;;  %v370_v59 = vld [vmem:[#allocation2 + $0x38] sm:$0xf0] }
  0x11   :  { %v345_v47 = vor.u32 %v371_v44, %v344_v43  ;;  %v341_v60 = vor.u32 %v370_v59, %v340_v58  ;;  %v336_v61 = vld [vmem:[#allocation2 + $0x24] sm:$0xf]  ;;  %v369_v62 = vld [vmem:[#allocation2 + $0x28] sm:$0xf0]  ;;  %v332_v0 = vld [vmem:[#allocation2 + $0x14] sm:$0xf] }
  0x12   :  { %155 = vmatpush.bf16.msra.mxu1 %v317_v12  ;;  %v337_v63 = vor.u32 %v369_v62, %v336_v61  ;;  %v368_v1 = vld [vmem:[#allocation2 + $0x18] sm:$0xf0]  ;;  %v328_v3 = vld [vmem:[#allocation2 + $0x4] sm:$0xf]  ;;  %v367_v4 = vld [vmem:[#allocation2 + $0x8] sm:$0xf0] }
  0x13   :  { %377 = vmatpush.bf16.msra.mxu3 %v317_v12  ;;  %v333_v2 = vor.u32 %v368_v1, %v332_v0  ;;  %v329_v5 = vor.u32 %v367_v4, %v328_v3  ;;  %v396_v7 = vld [vmem:[%s520_s3 + $0x1] ss:$0 sm:$0xff] }
  0x14   :  { %247 = vmatpush.bf16.msrb.mxu0 %v353_v37  ;;  %384 = vmatpush.bf16.msra.mxu2 %v353_v37 }
  0x16   :  { %156 = vmatpush.bf16.msra.mxu1 %v313_v15 }
  0x17   :  { %378 = vmatpush.bf16.msra.mxu3 %v313_v15 }
  0x18   :  { %248 = vmatpush.bf16.msrb.mxu0 %v349_v41  ;;  %385 = vmatpush.bf16.msra.mxu2 %v349_v41 }
  0x1a   :  { %293 = vmatmul.msk.bf16.gmra.mxu0 %vm53_vm0, %v40_v18  ;;  %157 = vmatpush.bf16.msra.mxu1 %v309_v21 }
  0x1b   :  { %379 = vmatpush.bf16.msra.mxu3 %v309_v21  ;;  %v397_v21 = vld [vmem:[%s520_s3 + $0x2] ss:$0 sm:$0xff] }
  0x1c   :  { %249 = vmatpush.bf16.msrb.mxu0 %v345_v47  ;;  %386 = vmatpush.bf16.msra.mxu2 %v345_v47 }
  0x1e   :  { %158 = vmatpush.bf16.msra.mxu1 %v305_v24 }
  0x1f   :  { %380 = vmatpush.bf16.msra.mxu3 %v305_v24 }
  0x20   :  { %250 = vmatpush.bf16.msrb.mxu0 %v341_v60  ;;  %387 = vmatpush.bf16.msra.mxu2 %v341_v60 }
  0x22   :  { %159 = vmatpush.bf16.msra.mxu1 %v301_v27 }
  0x23   :  { %381 = vmatpush.bf16.msra.mxu3 %v301_v27 }
  0x24   :  { %251 = vmatpush.bf16.msrb.mxu0 %v337_v63  ;;  %388 = vmatpush.bf16.msra.mxu2 %v337_v63 }
  0x26   :  { %160 = vmatpush.bf16.msra.mxu1 %v297_v30 }
  0x27   :  { %382 = vmatpush.bf16.msra.mxu3 %v297_v30 }
  0x28   :  { %252 = vmatpush.bf16.msrb.mxu0 %v333_v2  ;;  %389 = vmatpush.bf16.msra.mxu2 %v333_v2 }
  0x2c   :  { %253 = vmatpush.bf16.msrb.mxu0 %v329_v5  ;;  %390 = vmatpush.bf16.msra.mxu2 %v329_v5 }
  0x87   :  { %v69_v34 = vpop.f32.mrf.mxu0 }
  0x88   :  { %v70_v42 = vadd.f32 %v395_v38, %v69_v34 }
  0x8a   :  { %v79_v48 = vmax.f32 %v70_v42, 0.0 }
  0x8f   :  { %v71_v45 = vpop.f32.mrf.mxu0 }
  0x90   :  { %v72_v46 = vadd.f32 %v395_v38, %v71_v45 }
  0x92   :  { %v80_v49 = vmax.f32 %v72_v46, 0.0 }
  0x94   :  { %v83_v50 = vpack.c.bf16 %v80_v49, %v79_v48 }
  0x96   :  { %161 = vmatmul.bf16.vlgmr.msra.gmra.mxu1 %v83_v50 }
  0x97   :  { %v74_v51 = vpop.f32.mrf.mxu0 }
  0x98   :  { %v75_v52 = vadd.f32 %v395_v38, %v74_v51 }
  0x9a   :  { %v81_v55 = vmax.f32 %v75_v52, 0.0 }
  0x9f   :  { %v76_v53 = vpop.f32.mrf.mxu0 }
  0xa0   :  { %v77_v54 = vadd.f32 %v395_v38, %v76_v53 }
  0xa2   :  { %v82_v56 = vmax.f32 %v77_v54, 0.0 }
  0xa4   :  { %v84_v57 = vpack.c.bf16 %v82_v56, %v81_v55 }
  0xa6   :  { %166 = vmatmul.bf16.vlgmr.msra.gmra.mxu3 %v84_v57 }
 0x113   :  { %v162_v6 = vpop.f32.mrf.mxu1 }
 0x114   :  { %v163_v8 = vadd.f32 %v396_v7, %v162_v6 }
 0x116   :  { %v172_v11 = vmax.f32 %v163_v8, 0.0 }
 0x11b   :  { %v164_v9 = vpop.f32.mrf.mxu1 }
 0x11c   :  { %v165_v10 = vadd.f32 %v396_v7, %v164_v9 }
 0x11e   :  { %v173_v12 = vmax.f32 %v165_v10, 0.0 }
 0x120   :  { %v176_v13 = vpack.c.bf16 %v173_v12, %v172_v11 }
 0x122   :  { %254 = vmatmul.bf16.vlgmr.msrb.gmra.mxu0 %v176_v13 }
 0x129   :  { %v167_v14 = vpop.f32.mrf.mxu3 }
 0x12a   :  { %v168_v15 = vadd.f32 %v396_v7, %v167_v14 }
 0x12c   :  { %v174_v18 = vmax.f32 %v168_v15, 0.0 }
 0x131   :  { %v169_v16 = vpop.f32.mrf.mxu3 }
 0x132   :  { %v170_v17 = vadd.f32 %v396_v7, %v169_v16 }
 0x134   :  { %v175_v19 = vmax.f32 %v170_v17, 0.0 }
 0x136   :  { %v177_v20 = vpack.c.bf16 %v175_v19, %v174_v18 }
 0x138   :  { %259 = vmatmul.bf16.vlgmr.msra.gmra.mxu2 %v177_v20 }
 0x19f   :  { %v255_v22 = vpop.f32.mrf.mxu0 }
 0x1a0   :  { %v256_v23 = vadd.f32 %v397_v21, %v255_v22 }
 0x1a2   :  { %265 = vst [vmem:[#allocation5] sm:$0xff] %v256_v23 }
 0x1a7   :  { %v257_v24 = vpop.f32.mrf.mxu0 }
 0x1a8   :  { %v258_v25 = vadd.f32 %v397_v21, %v257_v24 }
 0x1aa   :  { %266 = vst [vmem:[#allocation5 + $0x8] sm:$0xff] %v258_v25 }
 0x1bb   :  { %v260_v26 = vpop.f32.mrf.mxu2 }
 0x1bc   :  { %v261_v27 = vadd.f32 %v397_v21, %v260_v26 }
 0x1be   :  { %267 = vst [vmem:[#allocation5 + $0x10] sm:$0xff] %v261_v27 }
 0x1c3   :  { %v262_v28 = vpop.f32.mrf.mxu2 }
 0x1c4   :  { %v263_v29 = vadd.f32 %v397_v21, %v262_v28 }
 0x1c6   :  { %268 = vst [vmem:[#allocation5 + $0x18] sm:$0xff] %v263_v29 }
 0x1c7   :  { %281 = dma.vmem_to_hbm [thread:$0]  %s274_s10, 512, %s276_s13, [#allocation4], %s451_s20, %s451_s20, %s452_s21  }
 0x1c8   :  { %448 = dma.done.wait [#allocation4], 512  }
 0x1c9   :  { %449 = vsyncadd [#allocation4], 4294966784 }
 0x1ca   :  { %286 = vsyncpa [#allocation3], 1 }
 0x1cb   :  { %287 = vsyncpa [#allocation4], 1 }

</bundles_post_ra>
